<compile_context>
chip_gen: v7x
topology: tpu7x:2x2x1
jax: 0.10.0
libtpu: 0.0.40
codegen_flags: <defaults>
</compile_context>

<pallas_src>
import math

import jax
import jax.numpy as jnp
from jax.experimental import pallas as pl
from jax.experimental.pallas import tpu as pltpu


def _add_pe_kernel(x_ref, pe_ref, o_ref):
    # x_ref / pe_ref / o_ref: (1, TR, C) tiles, same dtype -> single VPU add.
    o_ref[...] = x_ref[...] + pe_ref[...]


def make_positional_encoding(embed_dim: int = 512, max_seq_len: int = 5000,
                             dtype=jnp.float32):
    """Build the (1, max_seq_len, embed_dim) sinusoidal table exactly as the
    PyTorch PositionalEncoding.__init__ does (even cols = sin, odd cols = cos)."""
    pos = jnp.arange(max_seq_len, dtype=jnp.float32)[:, None]                # (L, 1)
    div = jnp.exp(jnp.arange(0, embed_dim, 2, dtype=jnp.float32)
                  * -(math.log(10000.0) / embed_dim))                        # (E/2,)
    angles = pos * div                                                       # (L, E/2)
    pe = jnp.stack([jnp.sin(angles), jnp.cos(angles)], axis=-1)              # (L, E/2, 2)
    pe = pe.reshape(max_seq_len, embed_dim)[None, :, :]                      # (1, L, E)
    return pe.astype(dtype)


def _sublane_align(dtype) -> int:
    # Required multiple for the second-to-last block dim.
    return {4: 8, 2: 16, 1: 32}.get(jnp.dtype(dtype).itemsize, 8)


def _pick_tile_rows(total_rows: int, align: int, max_rows: int) -> int:
    """Largest row-tile <= max_rows that divides total_rows and is a multiple
    of `align`; falls back to the full extent (always a legal block dim)."""
    upper = max(1, min(total_rows, max_rows))
    for t in range(upper, 0, -1):
        if total_rows % t == 0 and t % align == 0:
            return t
    return total_rows


def positional_encoding_forward(x: jax.Array, pe: jax.Array,
                                *, tile_bytes: int = 2 * 1024 * 1024) -> jax.Array:
    """x: (B, S, E), pe: (1, max_seq_len, E) with S <= max_seq_len."""
    B, S, E = x.shape
    assert pe.shape[0] == 1 and pe.shape[2] == E and S <= pe.shape[1]

    dtype = x.dtype
    itemsize = jnp.dtype(dtype).itemsize
    pe_s = pe[:, :S, :].astype(dtype)                      # (1, S, E), match x.dtype

    # Lane-dense repack for small embed dims: present a 128-wide last axis.
    flat = (E % 128 != 0) and ((S * E) % 128 == 0)
    if flat:
        rows, cols = (S * E) // 128, 128
        x_in = x.reshape(B, rows, cols)
        pe_in = pe_s.reshape(1, rows, cols)
    else:
        rows, cols = S, E
        x_in = x
        pe_in = pe_s

    align = _sublane_align(dtype)
    max_rows = max(1, tile_bytes // (cols * itemsize))     # ~2 MiB per tile
    tr = _pick_tile_rows(rows, align, max_rows)
    n_tiles = rows // tr

    out = pl.pallas_call(
        _add_pe_kernel,
        out_shape=jax.ShapeDtypeStruct((B, rows, cols), dtype),
        grid_spec=pltpu.PrefetchScalarGridSpec(
            num_scalar_prefetch=0,
            # batch is the innermost grid axis -> pe block index is constant
            # across consecutive steps, so Pallas keeps the pe tile resident.
            grid=(n_tiles, B),
            in_specs=[
                pl.BlockSpec((1, tr, cols), lambda s, b: (b, s, 0)),  # x
                pl.BlockSpec((1, tr, cols), lambda s, b: (0, s, 0)),  # pe (b-independent)
            ],
            out_specs=pl.BlockSpec((1, tr, cols), lambda s, b: (b, s, 0)),
        ),
        compiler_params=pltpu.CompilerParams(
            dimension_semantics=("parallel", "parallel"),
            vmem_limit_bytes=32 * 1024 * 1024,
        ),
        cost_estimate=pl.CostEstimate(
            flops=B * S * E,
            transcendentals=0,
            bytes_accessed=(2 * B + 1) * S * E * itemsize,
        ),
    )(x_in, pe_in)

    return out.reshape(B, S, E) if flat else out


if __name__ == "__main__":
    # Small shapes consistent with the module's forward: (batch, seq, embed)
    B, S, E = 2, 8, 32
    MAX_SEQ_LEN = 16

    key = jax.random.PRNGKey(0)
    x = jax.random.normal(key, (B, S, E), dtype=jnp.float32)

    pe = make_positional_encoding(embed_dim=E, max_seq_len=MAX_SEQ_LEN,
                                  dtype=x.dtype)

    out = positional_encoding_forward(x, pe)
    out = jax.block_until_ready(out)

    # reference check (plain JAX)
    ref = x + pe[:, :S, :]
    assert out.shape == (B, S, E)
    assert jnp.allclose(out, ref, atol=1e-6, rtol=1e-6)

    print("KERNEL_OK")
</pallas_src>

<mosaic_0001>
module attributes {stable_mosaic.version = 11 : i64} {
  func.func @_add_pe_kernel(%arg0: i32, %arg1: i32, %arg2: memref<1x2x128xf32, #tpu.memory_space<vmem>>, %arg3: memref<1x2x128xf32, #tpu.memory_space<vmem>>, %arg4: memref<1x2x128xf32, #tpu.memory_space<vmem>>) attributes {dimension_semantics = [#tpu.dimension_semantics<parallel>, #tpu.dimension_semantics<parallel>], iteration_bounds = array<i64: 1, 2>, scalar_prefetch = 0 : i64, scratch_operands = 0 : i64, tpu.core_type = #tpu.core_type<tc>, window_params = [{transform_indices = @transform_0, window_bounds = array<i64: 1, 2, 128>}, {transform_indices = @transform_1, window_bounds = array<i64: 1, 2, 128>}, {transform_indices = @transform_2, window_bounds = array<i64: 1, 2, 128>}]} {
    %c0 = arith.constant 0 : index
    %c0_0 = arith.constant 0 : index
    %c0_1 = arith.constant 0 : index
    %0 = vector.load %arg2[%c0, %c0_0, %c0_1] : memref<1x2x128xf32, #tpu.memory_space<vmem>>, vector<1x2x128xf32>
    %c0_2 = arith.constant 0 : index
    %c0_3 = arith.constant 0 : index
    %c0_4 = arith.constant 0 : index
    %1 = vector.load %arg3[%c0_2, %c0_3, %c0_4] : memref<1x2x128xf32, #tpu.memory_space<vmem>>, vector<1x2x128xf32>
    %2 = arith.addf %0, %1 : vector<1x2x128xf32>
    %c0_5 = arith.constant 0 : index
    %c0_6 = arith.constant 0 : index
    %c0_7 = arith.constant 0 : index
    %3 = vector.load %arg4[%c0_5, %c0_6, %c0_7] : memref<1x2x128xf32, #tpu.memory_space<vmem>>, vector<1x2x128xf32>
    tpu.vector_store %arg4[%c0_5, %c0_6, %c0_7], %2 {strides = array<i32>} : memref<1x2x128xf32, #tpu.memory_space<vmem>>, vector<1x2x128xf32>,
    return
  }
  func.func @transform_0(%arg0: i32, %arg1: i32) -> (i32, i32, i32) {
    %c0_i32 = arith.constant 0 : i32
    %c0_i32_0 = arith.constant 0 : i32
    return %arg1, %arg0, %c0_i32 : i32, i32, i32
  }
  func.func @transform_1(%arg0: i32, %arg1: i32) -> (i32, i32, i32) {
    %c0_i32 = arith.constant 0 : i32
    %c0_i32_0 = arith.constant 0 : i32
    %c0_i32_1 = arith.constant 0 : i32
    return %c0_i32, %arg0, %c0_i32_0 : i32, i32, i32
  }
  func.func @transform_2(%arg0: i32, %arg1: i32) -> (i32, i32, i32) {
    %c0_i32 = arith.constant 0 : i32
    %c0_i32_0 = arith.constant 0 : i32
    return %arg1, %arg0, %c0_i32 : i32, i32, i32
  }
}

</mosaic_0001>

<bundles_post_ra>
// kernel: tpu_custom_call.1
= control target key start
LH: loop header
LB: loop body
LE: loop exit
PB: predicated region body
PF: predicated region fallthrough
CT: control target
= control target key end

     0   :  { %7 = vsyncpa [#allocation3], 0  ;;  %s689_s0 = inlined_call_operand.hbm [shape: f32[2,2,128], index: 0, kind: input, shape index: {}]   ;;  %s690_s1 = inlined_call_operand.vmem [shape: f32[1,2,128], index: 1, kind: input, shape index: {}]   ;;  %s691_s2 = inlined_call_operand.hbm [shape: f32[2,2,128], index: 2, kind: output, shape index: {}]  }
   0x1   :  { %9 = vsyncpa [#allocation3 + $0x1], 0 }
   0x2   :  { %10 = vsyncpa [#allocation4], 0 }
   0x3   :  { %12 = vsyncpa [#allocation4 + $0x1], 0  ;;  %s514_s9 = smov 0   ;;  %s516_s10 = smov 0  }
   0x4   :  { %s518_s11 = smov 0   ;;  %s520_s12 = smov 0  }
   0x5   :  { %s522_s13 = smov 0   ;;  %s524_s14 = smov 0  }
   0x6 LB: > { %s307_s15 = sadd.s32 4294967295, %s495_s14   ;;  %s308_s16 = sadd.s32 4294967294, %s495_s14   ;;  %s495_s14 = sphi %s524_s14, %s18_s14   ;;  %s491_s13 = sphi %s522_s13, %s707_s13   ;;  %s487_s12 = sphi %s520_s12, %s706_s12   ;;  %s483_s11 = sphi %s518_s11, %s705_s11   ;;  %s479_s10 = sphi %s516_s10, %s704_s10   ;;  %s475_s9 = sphi %s514_s9, %s703_s9  }
   0x7   : > { %s27_s17 = sadd.s32 1, %s491_s13  ;;  %s39_s18 = sadd.s32 1, %s483_s11 }
   0x8   : > { %p28_p0 = scmp.ge.s32.totalorder %s27_s17, 2  ;;  %p46_p1 = scmp.ne.s32.totalorder %s483_s11, %s479_s10 }
   0x9   : > { %p47_p2 = scmp.eq.s32.totalorder %s495_s14, 0  ;;  %p52_p3 = scmp.ne.s32.totalorder %s479_s10, %s475_s9 }
   0xa   : > { %s709_s17 = smov (%p28_p0, %s27_s17), 0  ;;  %p53_p5 = scmp.eq.s32.totalorder %s307_s15, 0 }
   0xb   : > { %p555_p4 = por %p47_p2, %p46_p1  ;;  %s34_s20 = ssub.s32 %s491_s13, %s709_s17 }
   0xc   : > { %p104_p6 = scmp.eq.s32.totalorder %s307_s15, 1  ;;  %p37_p7 = scmp.eq.s32.totalorder %s34_s20, 0 }
   0xd   : > { %p561_p8 = por %p53_p5, %p52_p3  ;;  %p110_p10 = scmp.eq.s32.totalorder %s308_s16, 1 }
   0xe   : > { %p565_p9 = por %p104_p6, %p46_p1  ;;  %p333_p13 = scmp.lt.s32.totalorder %s495_s14, 2 }
   0xf   : > { %s570_s23 = scalar_select %p37_p7, %s483_s11, %s39_s18  }
  0x10   : > { %s695_s22 = scalar_select %p565_p9, 1, 0 }
  0x11   : > { %p572_p11 = por %p110_p10, %p52_p3  ;;  %s137_s25 = sand.u32 1, %s483_s11  }
  0x12   : > { %s312_s26 = sshll.u32 %s137_s25, 1  ;;  %s313_s27 = sshll.u32 %s491_s13, 5 }
  0x13   : > { %s696_s24 = scalar_select %p572_p11, 1, 0 }
  0x14   : > { %s583_s30 = scalar_lea.hbm %s689_s0, %s313_s27  ;;  %s141_s3 = scalar_lea.vmem [#allocation2], %s312_s26 }
  0x15   : > { %s149_s4 = sshll.u32 %s141_s3, 4  ;;  %p589_p0 = pnand %p333_p13, %p555_p4  ;;  %s585_s4 = int_to_ptr.vmem [resolvable:$true] %s149_s4 }
  0x16   : > { %s138_s6 = scalar_lea.sflag [#allocation3], %s137_s25  ;;  %s383_s7 = scalar_lea.hbm %s583_s30, 32 }
  0x17   : > { %p384_p3 = scmp.ne.s32.totalorder %s583_s30, %s383_s7  ;;  %p385_p5 = pneg %p589_p0 }
  0x18   : > { %s388_s16 = scalar_lea.hbm %s689_s0, 64  ;;  %p389_p4 = scmp.lt.u32.totalorder %s583_s30, %s689_s0 }
  0x19   : > { %p386_p6 = pnand %p385_p5, %p384_p3  ;;  %p390_p10 = scmp.lt.u32.totalorder %s388_s16, %s383_s7 }
  0x1a   : > { %p392_p12 = scmp.lt.u32.totalorder %s383_s7, %s583_s30 }
  0x1b   : > { %p387_p7 = pneg %p386_p6  ;;  %p391_p13 = por %p390_p10, %p389_p4 }
  0x1d   : > { %p393_p1 = por %p392_p12, %p391_p13 }
  0x1f   : > { %p394_p2 = pnand %p393_p1, %p387_p7 }
  0x21   : > { %397 = shalt.err (!%p394_p2)
}
  0x22   : > { %s398_s20 = scalar_lea.vmem %s585_s4, 32  ;;  %s497_s25 = smov [#allocation2]  }
  0x23   : > { %p399_p3 = scmp.ne.s32.totalorder %s585_s4, %s398_s20  ;;  %s403_s26 = sshll.u32 %s497_s25, 4  ;;  %s404_s26 = int_to_ptr.vmem [resolvable:$false] %s403_s26 }
  0x24   : > { %s405_s27 = scalar_lea.vmem %s404_s26, 64  ;;  %p406_p9 = scmp.lt.s32.totalorder %s585_s4, %s404_s26 }
  0x25   : > { %p401_p6 = pnand %p399_p3, %p385_p5  ;;  %p407_p4 = scmp.lt.s32.totalorder %s405_s27, %s398_s20 }
  0x27   : > { %p402_p11 = pneg %p401_p6  ;;  %p408_p10 = por %p407_p4, %p406_p9 }
  0x29   : > { %p409_p12 = pnand %p408_p10, %p402_p11 }
  0x2b   : > { %412 = shalt.err (!%p409_p12)
}
  0x2c   : > { %328 = dma.hbm_to_vmem [thread:$0]  (!%p589_p0), %s583_s30, 32, %s585_s4, %s138_s6  }
  0x2d   : > { %p698_p1 = scmp.lt.s32.totalorder %s495_s14, 3  ;;  %p699_p2 = scmp.ge.s32.totalorder %s495_s14, 1 }
  0x2f   : > { %p155_p5 = pnand %p699_p2, %p698_p1 }
  0x30   : > { %s625_s28 = sand.u32 (!%p155_p5), 1, %s479_s10  }
  0x31   : > { %158 = sbr.rel (%p155_p5) target bundleno = 83 (0x53), region = 28  ;;  %s315_s29 = sshll.u32 (!%p155_p5), %s625_s28, 1 }
  0x32   : > { %s161_s3 = scalar_lea.sflag (!%p155_p5), [#allocation3], %s625_s28  ;;  %s164_s7 = scalar_lea.vmem (!%p155_p5), [#allocation2], %s315_s29 }
  0x38   : > { %466 = dma.done.wait (%p561_p8), %s161_s3, 32  }
  0x39   : > { %468 = vsyncadd (%p561_p8), %s161_s3, 4294967264  ;;  %s188_s30 = scalar_lea.vmem [#allocation5], %s315_s29  ;;  %s318_s5 = sshll.u32 %s487_s12, 5  ;;  %v193_v0 = vld [vmem:[%s164_s7] sm:$0x3] }
  0x3a   : > { %s212_s4 = sshll.u32 %s188_s30, 4  ;;  %v194_v1 = vld [vmem:[%s690_s1] sm:$0x3]  ;;  %s642_s21 = scalar_lea.hbm %s691_s2, %s318_s5  ;;  %s637_s4 = int_to_ptr.vmem [resolvable:$true] %s212_s4 }
  0x3b   : > { %v195_v2 = vadd.f32 %v194_v1, %v193_v0  ;;  %s198_s18 = scalar_lea.sflag [#allocation4], %s625_s28  ;;  %s413_s19 = scalar_lea.vmem %s637_s4, 32 }
  0x3c   : > { %p414_p8 = scmp.ne.s32.totalorder %s637_s4, %s413_s19  ;;  %p700_p9 = scmp.ne.s32.totalorder %s695_s22, 0 }
  0x3d   : > { %196 = vst [vmem:[%s188_s30] sm:$0x3] %v195_v2  ;;  %s498_s12 = smov [#allocation5]  }
  0x3e   : > { %p415_p11 = pnand %p414_p8, %p700_p9  ;;  %s417_s20 = sshll.u32 %s498_s12, 4  ;;  %s418_s20 = int_to_ptr.vmem [resolvable:$false] %s417_s20 }
  0x3f   : > { %s419_s25 = scalar_lea.vmem %s418_s20, 64  ;;  %p420_p7 = scmp.lt.s32.totalorder %s637_s4, %s418_s20 }
  0x40   : > { %p416_p0 = pneg %p415_p11  ;;  %p421_p13 = scmp.lt.s32.totalorder %s419_s25, %s413_s19 }
  0x42   : > { %p422_p3 = por %p421_p13, %p420_p7 }
  0x44   : > { %p423_p6 = pnand %p422_p3, %p416_p0 }
  0x46   : > { %426 = shalt.err (!%p423_p6)
}
  0x47   : > { %s427_s26 = scalar_lea.hbm %s642_s21, 32  ;;  %s431_s29 = scalar_lea.hbm %s691_s2, 64 }
  0x48   : > { %p428_p4 = scmp.ne.s32.totalorder %s642_s21, %s427_s26  ;;  %p432_p1 = scmp.lt.u32.totalorder %s642_s21, %s691_s2 }
  0x49   : > { %p433_p2 = scmp.lt.u32.totalorder %s431_s29, %s427_s26  ;;  %p435_p8 = scmp.lt.u32.totalorder %s427_s26, %s642_s21 }
  0x4a   : > { %p429_p10 = pnand %p428_p4, %p700_p9 }
  0x4b   : > { %p434_p5 = por %p433_p2, %p432_p1 }
  0x4c   : > { %p430_p12 = pneg %p429_p10 }
  0x4d   : > { %p436_p11 = por %p435_p8, %p434_p5 }
  0x4f   : > { %p437_p0 = pnand %p436_p11, %p430_p12 }
  0x51   : > { %440 = shalt.err (!%p437_p0)
}
  0x52   : > { %323 = dma.vmem_to_hbm [thread:$0]  (%p700_p9), %s637_s4, 32, %s642_s21, %s198_s18  }
  0x53 PF: > { %s224_s30 = sand.u32 1, %s475_s9   ;;  %p701_p7 = scmp.ne.s32.totalorder %s696_s24, 0 }
  0x54   : > { %p702_p13 = scmp.ge.s32.totalorder %s495_s14, 2  ;;  %s225_s5 = scalar_lea.sflag [#allocation4], %s224_s30 }
  0x56   : > { %p330_p3 = pnand %p702_p13, %p701_p7 }
  0x58   : > { %470 = dma.done.wait (!%p330_p3), %s225_s5, 32  }
  0x59   : > { %472 = vsyncadd (!%p330_p3), %s225_s5, 4294967264  ;;  %s18_s14 = sadd.s32 1, %s495_s14   ;;  %s703_s9 = smov %s479_s10 }
  0x5a   : > { %p15_p6 = scmp.ge.s32.totalorder %s18_s14, 4   ;;  %s704_s10 = smov %s483_s11 }
  0x5b   : > { %s705_s11 = smov %s570_s23  ;;  %s706_s12 = smov %s491_s13 }
  0x5c   : > { %s707_s13 = smov %s709_s17  ;;  %17 = sbr.rel (!%p15_p6) target bundleno = 6 (0x6), region = 76 }
  0x63   :  { %230 = vsyncpa [#allocation3], 1 }
  0x64   :  { %232 = vsyncpa [#allocation3 + $0x1], 1 }
  0x65   :  { %233 = vsyncpa [#allocation4], 1 }
  0x66   :  { %235 = vsyncpa [#allocation4 + $0x1], 1 }

</bundles_post_ra>
